<compile_context>
chip_gen: v5e
topology: v5e:2x2
jax: 0.10.0
libtpu: 0.0.40
codegen_flags: <defaults>
</compile_context>

<pallas_src>
import functools

import jax
import jax.numpy as jnp
from jax import lax
from jax.experimental import pallas as pl
from jax.experimental.pallas import tpu as pltpu


def _tversky_ce_kernel(x_ref, t_ref, w_ref,
                       tp_ref, ps_ref, os_ref, cn_ref, cd_ref,
                       tp_acc, ps_acc, os_acc, cn_acc, cd_acc,
                       *, ignore_index, hw_valid, tile_hw, nh_total):
    """One grid step = one (sample, pixel-split, pixel-tile).
    Classes sit on the sublane axis, pixels on the 128-wide lane axis."""
    s_idx = pl.program_id(1)
    h = pl.program_id(2)
    nh_s = pl.num_programs(2)
    g = s_idx * nh_s + h                      # global pixel-tile index

    @pl.when(h == 0)
    def _():
        tp_acc[...] = jnp.zeros_like(tp_acc)
        ps_acc[...] = jnp.zeros_like(ps_acc)
        os_acc[...] = jnp.zeros_like(os_acc)
        cn_acc[...] = jnp.zeros_like(cn_acc)
        cd_acc[...] = jnp.zeros_like(cd_acc)

    def accumulate(masked):
        x = x_ref[0].astype(jnp.float32)          # (C, T) logits, upcast in-register
        t = t_ref[0]                              # (1, T) int32 labels
        w = w_ref[...].astype(jnp.float32)        # (C, 1) per-class weights
        c, tile = x.shape

        classes = lax.broadcasted_iota(jnp.int32, (c, tile), 0)
        onehot_b = (t == classes)                 # (C, T) bool
        valid_b = (t != ignore_index)             # (1, T) bool
        if masked:                                # only the final global tile is partial
            lane = lax.broadcasted_iota(jnp.int32, (1, tile), 1)
            inb = (g * tile_hw + lane) < hw_valid                # (1, T) bool
            x = jnp.where(inb, x, 0.0)            # sanitize OOB lanes (undefined contents)
            onehot_b = jnp.logical_and(onehot_b, inb)
            valid_b = jnp.logical_and(valid_b, inb)
        onehot = onehot_b.astype(jnp.float32)
        validf = valid_b.astype(jnp.float32)

        # numerically stable softmax over the class (sublane) axis - single exp pass
        m = jnp.max(x, axis=0, keepdims=True)     # (1, T)
        z = x - m
        e = jnp.exp(z)
        ssum = jnp.sum(e, axis=0, keepdims=True)  # (1, T)
        p = e * pl.reciprocal(ssum, approx=True)  # EUP vrcp slot (frees VPU)
        lse = jnp.log(ssum)
        if masked:
            p = p * inb.astype(jnp.float32)       # OOB lanes contribute nothing to sum(p)

        # per-class partial sums over the pixel (lane) axis
        tp_t = jnp.sum(p * onehot, axis=1, keepdims=True)    # (C, 1)
        ps_t = jnp.sum(p, axis=1, keepdims=True)              # (C, 1)  fp = ps - tp (glue)
        os_t = jnp.sum(onehot, axis=1, keepdims=True)          # (C, 1)  fn = os - tp (glue)

        # weighted cross-entropy partial sums (PyTorch 'mean' reduction semantics);
        # validf is the sole mask - it zeroes ignored and OOB pixels.
        z_true = jnp.sum(onehot * z, axis=0, keepdims=True)    # (1, T)
        nll = lse - z_true                                     # -log p_true
        wpix = jnp.sum(onehot * w, axis=0, keepdims=True)      # (1, T)
        vw = validf * wpix
        cn_t = jnp.sum(vw * nll, axis=1, keepdims=True)        # (1, 1)
        cd_t = jnp.sum(vw, axis=1, keepdims=True)              # (1, 1)

        tp_acc[...] += tp_t
        ps_acc[...] += ps_t
        os_acc[...] += os_t
        cn_acc[...] += cn_t
        cd_acc[...] += cd_t

    if hw_valid % tile_hw == 0:
        accumulate(masked=False)                  # every tile fully valid - zero masking cost
    else:
        @pl.when(g != nh_total - 1)               # fast path: fully-valid tiles pay no masking
        def _():
            accumulate(masked=False)

        @pl.when(g == nh_total - 1)               # only the last global tile is partial
        def _():
            accumulate(masked=True)

    @pl.when(h == nh_s - 1)
    def _():
        tp_ref[0, 0] = tp_acc[...]
        ps_ref[0, 0] = ps_acc[...]
        os_ref[0, 0] = os_acc[...]
        cn_ref[0, 0] = cn_acc[...]
        cd_ref[0, 0] = cd_acc[...]


def _vmem_budget_and_limit():
    """Generation-aware VMEM budgeting: v5e/v6e have 128 MiB physical VMEM, v7x 64 MiB."""
    try:
        cap = int(pltpu.get_tpu_info().vmem_capacity_bytes)
    except Exception:
        cap = 64 * 1024 * 1024
    if cap >= 100 * 1024 * 1024:                  # v5e / v6e
        return 48 * 1024 * 1024, 96 * 1024 * 1024
    return 20 * 1024 * 1024, 32 * 1024 * 1024     # v7x (or unknown): stay under 32 MiB scoped


def _pick_tile_hw(hw, c, itemsize, budget_bytes):
    """Largest multiple of 128 pixels/tile such that double-buffered inputs plus
    ~8 live (C, tile) f32 temporaries (x, e, p, onehot, products) fit the VMEM budget."""
    per_pixel = c * (2 * itemsize + 8 * 4) + 64   # 2x input bufs + f32 temps + (1,T) rows
    by_vmem = budget_bytes // per_pixel
    tile = (min(by_vmem, 32768) // 128) * 128
    hw_up = ((hw + 127) // 128) * 128
    return max(128, min(tile, hw_up))


def tversky_focal_ce_loss(predict, target, *, loss_weight=None,
                          tversky_weight=0.5, tversky_smooth=1.0,
                          tversky_alpha=0.7, tversky_gamma=1.33,
                          ignore_index=-100, max_tile_hw=None):
    assert predict.shape[0] == target.shape[0], "predict & target batch size mismatch"
    N, C, H, W = predict.shape
    HW = H * W

    budget, vmem_limit = _vmem_budget_and_limit()
    tile_hw = _pick_tile_hw(HW, C, predict.dtype.itemsize, budget)
    if max_tile_hw is not None:                   # test hook: force small tiles
        tile_hw = max(128, min(tile_hw, (max_tile_hw // 128) * 128))
    nh = pl.cdiv(HW, tile_hw)

    # v7x has 2 TensorCores: for tiny batches also split the pixel axis across cores.
    n_split = 2 if (N <= 2 and nh >= 2 and nh % 2 == 0) else 1
    nh_s = nh // n_split

    # glue: pure reshapes only - no HBM transpose, no dtype cast, no padding copy
    x = predict.reshape(N, C, HW)                 # stream native dtype; kernel upcasts
    t = target.reshape(N, 1, HW).astype(jnp.int32)

    if loss_weight is None:
        w = jnp.ones((C, 1), jnp.float32)
    else:
        w = jnp.asarray(loss_weight, jnp.float32).reshape(C, 1)

    kernel = functools.partial(_tversky_ce_kernel, ignore_index=ignore_index,
                               hw_valid=HW, tile_hw=tile_hw, nh_total=nh)

    out_shape = (
        jax.ShapeDtypeStruct((N, n_split, C, 1), jnp.float32),   # tp
        jax.ShapeDtypeStruct((N, n_split, C, 1), jnp.float32),   # sum(p)
        jax.ShapeDtypeStruct((N, n_split, C, 1), jnp.float32),   # onehot pixel count
        jax.ShapeDtypeStruct((N, n_split, 1, 1), jnp.float32),   # CE numerator
        jax.ShapeDtypeStruct((N, n_split, 1, 1), jnp.float32),   # CE denominator
    )

    grid_spec = pltpu.PrefetchScalarGridSpec(
        num_scalar_prefetch=0,
        grid=(N, n_split, nh_s),      # batch (parallel), core-split (parallel), pixel tiles (arbitrary)
        in_specs=[
            pl.BlockSpec((1, C, tile_hw), lambda n, s, h: (n, 0, s * nh_s + h)),   # logits (NCHW-native)
            pl.BlockSpec((1, 1, tile_hw), lambda n, s, h: (n, 0, s * nh_s + h)),   # labels (lane-dense)
            pl.BlockSpec((C, 1), lambda n, s, h: (0, 0)),                          # class weights
        ],
        out_specs=[
            pl.BlockSpec((1, 1, C, 1), lambda n, s, h: (n, s, 0, 0)),
            pl.BlockSpec((1, 1, C, 1), lambda n, s, h: (n, s, 0, 0)),
            pl.BlockSpec((1, 1, C, 1), lambda n, s, h: (n, s, 0, 0)),
            pl.BlockSpec((1, 1, 1, 1), lambda n, s, h: (n, s, 0, 0)),
            pl.BlockSpec((1, 1, 1, 1), lambda n, s, h: (n, s, 0, 0)),
        ],
        scratch_shapes=[
            pltpu.VMEM((C, 1), jnp.float32),      # tp accumulator
            pltpu.VMEM((C, 1), jnp.float32),      # sum(p) accumulator
            pltpu.VMEM((C, 1), jnp.float32),      # onehot-count accumulator
            pltpu.VMEM((1, 1), jnp.float32),      # CE numerator accumulator
            pltpu.VMEM((1, 1), jnp.float32),      # CE denominator accumulator
        ],
    )

    tp, ps, osum, cn, cd = pl.pallas_call(
        kernel,
        out_shape=out_shape,
        grid_spec=grid_spec,
        compiler_params=pltpu.CompilerParams(
            dimension_semantics=("parallel", "parallel", "arbitrary"),
            vmem_limit_bytes=vmem_limit,
        ),
    )(x, t, w)

    tp = jnp.sum(tp, axis=1).reshape(N, C)
    ps = jnp.sum(ps, axis=1).reshape(N, C)
    osum = jnp.sum(osum, axis=1).reshape(N, C)
    fp = ps - tp            # fp = sum(p) - tp
    fn = osum - tp          # fn = count  - tp

    # --- tiny finalization (glue) ---
    num = tp + tversky_smooth
    den = tp + tversky_smooth + tversky_alpha * fp + (1.0 - tversky_alpha) * fn
    one_minus_ti = jnp.maximum(1.0 - num / den, 0.0)      # clamp rounding noise before pow
    per_sample_class = jnp.power(one_minus_ti, 1.0 / tversky_gamma)        # (N, C)
    per_class = jnp.mean(per_sample_class, axis=0) * w.reshape(C)          # (C,)
    class_mask = (jnp.arange(C) != ignore_index).astype(jnp.float32)
    tversky_loss = jnp.sum(per_class * class_mask) / C

    ce_loss = jnp.sum(cn) / jnp.sum(cd)   # TODO(synk): NaN if every pixel is ignore_index (matches PyTorch)

    return tversky_weight * tversky_loss + (1.0 - tversky_weight) * ce_loss


def _reference(predict, target, loss_weight, tversky_weight=0.5, smooth=1.0,
               alpha=0.7, gamma=1.33, ignore_index=-100):
    """Pure-JAX reference of the same semantics (correctness check)."""
    N, C, H, W = predict.shape
    logp = jax.nn.log_softmax(predict.astype(jnp.float32), axis=1)
    p = jnp.exp(logp)
    onehot = jax.nn.one_hot(target, C, axis=1, dtype=jnp.float32)   # (N, C, H, W)
    tp = jnp.sum(p * onehot, axis=(2, 3))
    fp = jnp.sum(p * (1.0 - onehot), axis=(2, 3))
    fn = jnp.sum((1.0 - p) * onehot, axis=(2, 3))
    ti = (tp + smooth) / (tp + smooth + alpha * fp + (1.0 - alpha) * fn)
    per_class = jnp.mean(jnp.power(1.0 - ti, 1.0 / gamma), axis=0)
    w = jnp.ones((C,), jnp.float32) if loss_weight is None else jnp.asarray(loss_weight, jnp.float32)
    mask = (jnp.arange(C) != ignore_index).astype(jnp.float32)
    tv = jnp.sum(per_class * w * mask) / C

    valid = (target != ignore_index).astype(jnp.float32)
    nll = -jnp.sum(onehot * logp, axis=1)                           # (N, H, W)
    wpix = w[jnp.clip(target, 0, C - 1)]
    ce = jnp.sum(valid * wpix * nll) / jnp.sum(valid * wpix)
    return tversky_weight * tv + (1.0 - tversky_weight) * ce


if __name__ == "__main__":
    key = jax.random.PRNGKey(0)
    k1, k2, k3, k4, k5 = jax.random.split(key, 5)

    # Test 1: canonical small shapes (f32 logits, single full tile).
    N, C, H, W = 2, 4, 16, 16
    predict = jax.random.normal(k1, (N, C, H, W), jnp.float32)
    target = jax.random.randint(k2, (N, H, W), 0, C, dtype=jnp.int32)
    loss_weight = jnp.array([1.0, 2.0, 0.5, 1.5], jnp.float32)   # deterministic class weights

    loss = jax.block_until_ready(
        tversky_focal_ce_loss(predict, target, loss_weight=loss_weight))
    ref = _reference(predict, target, loss_weight)
    # tolerance accounts for approx-reciprocal softmax normalization (EUP vrcp)
    assert jnp.allclose(loss, ref, rtol=5e-4, atol=5e-4), (float(loss), float(ref))

    # Test 2: bf16 logits streamed natively, non-tile-aligned HW (partial last tile),
    # ignore_index pixels, multi-tile + 2-way pixel split (N=1) via forced small tiles.
    N2, C2, H2, W2 = 1, 5, 16, 25                   # HW = 400 -> 4 tiles of 128 (last partial)
    predict2 = jax.random.normal(k3, (N2, C2, H2, W2), jnp.float32).astype(jnp.bfloat16)
    target2 = jax.random.randint(k4, (N2, H2, W2), 0, C2, dtype=jnp.int32)
    drop = jax.random.bernoulli(k5, 0.2, (N2, H2, W2))
    target2 = jnp.where(drop, -100, target2)
    lw2 = jnp.array([1.0, 0.5, 2.0, 1.5, 0.25], jnp.float32)

    loss2 = jax.block_until_ready(
        tversky_focal_ce_loss(predict2, target2, loss_weight=lw2, max_tile_hw=128))
    ref2 = _reference(predict2, target2, lw2)
    assert jnp.allclose(loss2, ref2, rtol=5e-4, atol=5e-4), (float(loss2), float(ref2))

    print("KERNEL_OK")
</pallas_src>

<mosaic_0001>
module attributes {stable_mosaic.version = 11 : i64} {
  func.func @_tversky_ce_kernel(%arg0: i32, %arg1: i32, %arg2: i32, %arg3: memref<1x4x256xf32, #tpu.memory_space<vmem>>, %arg4: memref<1x1x256xi32, #tpu.memory_space<vmem>>, %arg5: memref<4x1xf32, #tpu.memory_space<vmem>>, %arg6: memref<1x1x4x1xf32, #tpu.memory_space<vmem>>, %arg7: memref<1x1x4x1xf32, #tpu.memory_space<vmem>>, %arg8: memref<1x1x4x1xf32, #tpu.memory_space<vmem>>, %arg9: memref<1x1x1x1xf32, #tpu.memory_space<vmem>>, %arg10: memref<1x1x1x1xf32, #tpu.memory_space<vmem>>, %arg11: memref<4x1xf32, #tpu.memory_space<vmem>>, %arg12: memref<4x1xf32, #tpu.memory_space<vmem>>, %arg13: memref<4x1xf32, #tpu.memory_space<vmem>>, %arg14: memref<1x1xf32, #tpu.memory_space<vmem>>, %arg15: memref<1x1xf32, #tpu.memory_space<vmem>>) attributes {dimension_semantics = [#tpu.dimension_semantics<parallel>, #tpu.dimension_semantics<parallel>, #tpu.dimension_semantics<arbitrary>], iteration_bounds = array<i64: 2, 1, 1>, scalar_prefetch = 0 : i64, scratch_operands = 5 : i64, tpu.core_type = #tpu.core_type<tc>, window_params = [{transform_indices = @transform_0, window_bounds = array<i64: 1, 4, 256>}, {transform_indices = @transform_1, window_bounds = array<i64: 1, 1, 256>}, {pipeline_mode = #tpu.pipeline_mode<synchronous>, transform_indices = @transform_2, window_bounds = array<i64: 4, 1>}, {transform_indices = @transform_3, window_bounds = array<i64: 1, 1, 4, 1>}, {transform_indices = @transform_4, window_bounds = array<i64: 1, 1, 4, 1>}, {transform_indices = @transform_5, window_bounds = array<i64: 1, 1, 4, 1>}, {transform_indices = @transform_6, window_bounds = array<i64: 1, 1, 1, 1>}, {transform_indices = @transform_7, window_bounds = array<i64: 1, 1, 1, 1>}]} {
    %c0_i32 = arith.constant 0 : i32
    %0 = arith.cmpi eq, %arg2, %c0_i32 : i32
    %1 = arith.extui %0 : i1 to i32
    %c0_i32_0 = arith.constant 0 : i32
    %2 = arith.cmpi ne, %1, %c0_i32_0 : i32
    scf.if %2 {
      %cst_38 = arith.constant 0.000000e+00 : f32
      %67 = vector.broadcast %cst_38 : f32 to vector<4x1xf32>
      %c0_39 = arith.constant 0 : index
      %c0_40 = arith.constant 0 : index
      %68 = vector.load %arg11[%c0_39, %c0_40] : memref<4x1xf32, #tpu.memory_space<vmem>>, vector<4x1xf32>
      tpu.vector_store %arg11[%c0_39, %c0_40], %67 {strides = array<i32>} : memref<4x1xf32, #tpu.memory_space<vmem>>, vector<4x1xf32>,
      %cst_41 = arith.constant 0.000000e+00 : f32
      %69 = vector.broadcast %cst_41 : f32 to vector<4x1xf32>
      %c0_42 = arith.constant 0 : index
      %c0_43 = arith.constant 0 : index
      %70 = vector.load %arg12[%c0_42, %c0_43] : memref<4x1xf32, #tpu.memory_space<vmem>>, vector<4x1xf32>
      tpu.vector_store %arg12[%c0_42, %c0_43], %69 {strides = array<i32>} : memref<4x1xf32, #tpu.memory_space<vmem>>, vector<4x1xf32>,
      %cst_44 = arith.constant 0.000000e+00 : f32
      %71 = vector.broadcast %cst_44 : f32 to vector<4x1xf32>
      %c0_45 = arith.constant 0 : index
      %c0_46 = arith.constant 0 : index
      %72 = vector.load %arg13[%c0_45, %c0_46] : memref<4x1xf32, #tpu.memory_space<vmem>>, vector<4x1xf32>
      tpu.vector_store %arg13[%c0_45, %c0_46], %71 {strides = array<i32>} : memref<4x1xf32, #tpu.memory_space<vmem>>, vector<4x1xf32>,
      %cst_47 = arith.constant 0.000000e+00 : f32
      %73 = vector.broadcast %cst_47 : f32 to vector<1x1xf32>
      %c0_48 = arith.constant 0 : index
      %c0_49 = arith.constant 0 : index
      %74 = vector.load %arg14[%c0_48, %c0_49] : memref<1x1xf32, #tpu.memory_space<vmem>>, vector<1x1xf32>
      tpu.vector_store %arg14[%c0_48, %c0_49], %73 {strides = array<i32>} : memref<1x1xf32, #tpu.memory_space<vmem>>, vector<1x1xf32>,
      %cst_50 = arith.constant 0.000000e+00 : f32
      %75 = vector.broadcast %cst_50 : f32 to vector<1x1xf32>
      %c0_51 = arith.constant 0 : index
      %c0_52 = arith.constant 0 : index
      %76 = vector.load %arg15[%c0_51, %c0_52] : memref<1x1xf32, #tpu.memory_space<vmem>>, vector<1x1xf32>
      tpu.vector_store %arg15[%c0_51, %c0_52], %75 {strides = array<i32>} : memref<1x1xf32, #tpu.memory_space<vmem>>, vector<1x1xf32>,
    } else {
    }
    %c0 = arith.constant 0 : index
    %c0_1 = arith.constant 0 : index
    %c0_2 = arith.constant 0 : index
    %3 = vector.load %arg3[%c0, %c0_1, %c0_2] : memref<1x4x256xf32, #tpu.memory_space<vmem>>, vector<1x4x256xf32>
    %4 = vector.shape_cast %3 : vector<1x4x256xf32> to vector<4x256xf32>
    %c0_3 = arith.constant 0 : index
    %c0_4 = arith.constant 0 : index
    %c0_5 = arith.constant 0 : index
    %5 = vector.load %arg4[%c0_3, %c0_4, %c0_5] : memref<1x1x256xi32, #tpu.memory_space<vmem>>, vector<1x1x256xi32>
    %6 = vector.shape_cast %5 : vector<1x1x256xi32> to vector<1x256xi32>
    %c0_6 = arith.constant 0 : index
    %c0_7 = arith.constant 0 : index
    %7 = vector.load %arg5[%c0_6, %c0_7] : memref<4x1xf32, #tpu.memory_space<vmem>>, vector<4x1xf32>
    %8 = tpu.iota {dimensions = array<i32: 0>} : vector<4x256xi32>
    %9 = vector.broadcast %6 : vector<1x256xi32> to vector<4x256xi32>
    %10 = arith.cmpi eq, %9, %8 : vector<4x256xi32>
    %c-100_i32 = arith.constant -100 : i32
    %11 = vector.broadcast %c-100_i32 : i32 to vector<1x256xi32>
    %12 = arith.cmpi ne, %6, %11 : vector<1x256xi32>
    %13 = arith.extui %10 : vector<4x256xi1> to vector<4x256xi32>
    %14 = arith.sitofp %13 : vector<4x256xi32> to vector<4x256xf32>
    %15 = arith.extui %12 : vector<1x256xi1> to vector<1x256xi32>
    %16 = arith.sitofp %15 : vector<1x256xi32> to vector<1x256xf32>
    %cst = arith.constant dense<0xFF800000> : vector<256xf32>
    %17 = vector.multi_reduction <maximumf>, %4, %cst [0] : vector<4x256xf32> to vector<256xf32>
    %18 = vector.shape_cast %17 : vector<256xf32> to vector<1x256xf32>
    %19 = vector.broadcast %18 : vector<1x256xf32> to vector<4x256xf32>
    %20 = arith.subf %4, %19 : vector<4x256xf32>
    %21 = math.exp %20 : vector<4x256xf32>
    %cst_8 = arith.constant dense<0.000000e+00> : vector<256xf32>
    %22 = vector.multi_reduction <add>, %21, %cst_8 [0] : vector<4x256xf32> to vector<256xf32>
    %23 = vector.shape_cast %22 : vector<256xf32> to vector<1x256xf32>
    %24 = tpu.reciprocal %23 {approx = true} : vector<1x256xf32> -> vector<1x256xf32>
    %25 = vector.broadcast %24 : vector<1x256xf32> to vector<4x256xf32>
    %26 = arith.mulf %21, %25 : vector<4x256xf32>
    %27 = math.log %23 : vector<1x256xf32>
    %28 = arith.mulf %26, %14 : vector<4x256xf32>
    %cst_9 = arith.constant dense<0.000000e+00> : vector<4xf32>
    %29 = vector.multi_reduction <add>, %28, %cst_9 [1] : vector<4x256xf32> to vector<4xf32>
    %30 = vector.shape_cast %29 : vector<4xf32> to vector<4x1xf32>
    %cst_10 = arith.constant dense<0.000000e+00> : vector<4xf32>
    %31 = vector.multi_reduction <add>, %26, %cst_10 [1] : vector<4x256xf32> to vector<4xf32>
    %32 = vector.shape_cast %31 : vector<4xf32> to vector<4x1xf32>
    %cst_11 = arith.constant dense<0.000000e+00> : vector<4xf32>
    %33 = vector.multi_reduction <add>, %14, %cst_11 [1] : vector<4x256xf32> to vector<4xf32>
    %34 = vector.shape_cast %33 : vector<4xf32> to vector<4x1xf32>
    %35 = arith.mulf %14, %20 : vector<4x256xf32>
    %cst_12 = arith.constant dense<0.000000e+00> : vector<256xf32>
    %36 = vector.multi_reduction <add>, %35, %cst_12 [0] : vector<4x256xf32> to vector<256xf32>
    %37 = vector.shape_cast %36 : vector<256xf32> to vector<1x256xf32>
    %38 = arith.subf %27, %37 : vector<1x256xf32>
    %39 = vector.broadcast %7 : vector<4x1xf32> to vector<4x256xf32>
    %40 = arith.mulf %14, %39 : vector<4x256xf32>
    %cst_13 = arith.constant dense<0.000000e+00> : vector<256xf32>
    %41 = vector.multi_reduction <add>, %40, %cst_13 [0] : vector<4x256xf32> to vector<256xf32>
    %42 = vector.shape_cast %41 : vector<256xf32> to vector<1x256xf32>
    %43 = arith.mulf %16, %42 : vector<1x256xf32>
    %44 = arith.mulf %43, %38 : vector<1x256xf32>
    %cst_14 = arith.constant dense<0.000000e+00> : vector<1xf32>
    %45 = vector.multi_reduction <add>, %44, %cst_14 [1] : vector<1x256xf32> to vector<1xf32>
    %46 = vector.shape_cast %45 : vector<1xf32> to vector<1x1xf32>
    %cst_15 = arith.constant dense<0.000000e+00> : vector<1xf32>
    %47 = vector.multi_reduction <add>, %43, %cst_15 [1] : vector<1x256xf32> to vector<1xf32>
    %48 = vector.shape_cast %47 : vector<1xf32> to vector<1x1xf32>
    %c0_16 = arith.constant 0 : index
    %c0_17 = arith.constant 0 : index
    %49 = vector.load %arg11[%c0_16, %c0_17] : memref<4x1xf32, #tpu.memory_space<vmem>>, vector<4x1xf32>
    %50 = arith.addf %49, %30 : vector<4x1xf32>
    %c0_18 = arith.constant 0 : index
    %c0_19 = arith.constant 0 : index
    %51 = vector.load %arg11[%c0_18, %c0_19] : memref<4x1xf32, #tpu.memory_space<vmem>>, vector<4x1xf32>
    tpu.vector_store %arg11[%c0_18, %c0_19], %50 {strides = array<i32>} : memref<4x1xf32, #tpu.memory_space<vmem>>, vector<4x1xf32>,
    %c0_20 = arith.constant 0 : index
    %c0_21 = arith.constant 0 : index
    %52 = vector.load %arg12[%c0_20, %c0_21] : memref<4x1xf32, #tpu.memory_space<vmem>>, vector<4x1xf32>
    %53 = arith.addf %52, %32 : vector<4x1xf32>
    %c0_22 = arith.constant 0 : index
    %c0_23 = arith.constant 0 : index
    %54 = vector.load %arg12[%c0_22, %c0_23] : memref<4x1xf32, #tpu.memory_space<vmem>>, vector<4x1xf32>
    tpu.vector_store %arg12[%c0_22, %c0_23], %53 {strides = array<i32>} : memref<4x1xf32, #tpu.memory_space<vmem>>, vector<4x1xf32>,
    %c0_24 = arith.constant 0 : index
    %c0_25 = arith.constant 0 : index
    %55 = vector.load %arg13[%c0_24, %c0_25] : memref<4x1xf32, #tpu.memory_space<vmem>>, vector<4x1xf32>
    %56 = arith.addf %55, %34 : vector<4x1xf32>
    %c0_26 = arith.constant 0 : index
    %c0_27 = arith.constant 0 : index
    %57 = vector.load %arg13[%c0_26, %c0_27] : memref<4x1xf32, #tpu.memory_space<vmem>>, vector<4x1xf32>
    tpu.vector_store %arg13[%c0_26, %c0_27], %56 {strides = array<i32>} : memref<4x1xf32, #tpu.memory_space<vmem>>, vector<4x1xf32>,
    %c0_28 = arith.constant 0 : index
    %c0_29 = arith.constant 0 : index
    %58 = vector.load %arg14[%c0_28, %c0_29] : memref<1x1xf32, #tpu.memory_space<vmem>>, vector<1x1xf32>
    %59 = arith.addf %58, %46 : vector<1x1xf32>
    %c0_30 = arith.constant 0 : index
    %c0_31 = arith.constant 0 : index
    %60 = vector.load %arg14[%c0_30, %c0_31] : memref<1x1xf32, #tpu.memory_space<vmem>>, vector<1x1xf32>
    tpu.vector_store %arg14[%c0_30, %c0_31], %59 {strides = array<i32>} : memref<1x1xf32, #tpu.memory_space<vmem>>, vector<1x1xf32>,
    %c0_32 = arith.constant 0 : index
    %c0_33 = arith.constant 0 : index
    %61 = vector.load %arg15[%c0_32, %c0_33] : memref<1x1xf32, #tpu.memory_space<vmem>>, vector<1x1xf32>
    %62 = arith.addf %61, %48 : vector<1x1xf32>
    %c0_34 = arith.constant 0 : index
    %c0_35 = arith.constant 0 : index
    %63 = vector.load %arg15[%c0_34, %c0_35] : memref<1x1xf32, #tpu.memory_space<vmem>>, vector<1x1xf32>
    tpu.vector_store %arg15[%c0_34, %c0_35], %62 {strides = array<i32>} : memref<1x1xf32, #tpu.memory_space<vmem>>, vector<1x1xf32>,
    %c0_i32_36 = arith.constant 0 : i32
    %64 = arith.cmpi eq, %arg2, %c0_i32_36 : i32
    %65 = arith.extui %64 : i1 to i32
    %c0_i32_37 = arith.constant 0 : i32
    %66 = arith.cmpi ne, %65, %c0_i32_37 : i32
    scf.if %66 {
      %c0_38 = arith.constant 0 : index
      %c0_39 = arith.constant 0 : index
      %67 = vector.load %arg11[%c0_38, %c0_39] : memref<4x1xf32, #tpu.memory_space<vmem>>, vector<4x1xf32>
      %c0_40 = arith.constant 0 : index
      %c0_41 = arith.constant 0 : index
      %c0_42 = arith.constant 0 : index
      %c0_43 = arith.constant 0 : index
      %68 = vector.load %arg6[%c0_40, %c0_41, %c0_42, %c0_43] : memref<1x1x4x1xf32, #tpu.memory_space<vmem>>, vector<1x1x4x1xf32>
      %69 = vector.shape_cast %68 : vector<1x1x4x1xf32> to vector<4x1xf32>
      %70 = vector.shape_cast %67 : vector<4x1xf32> to vector<1x1x4x1xf32>
      tpu.vector_store %arg6[%c0_40, %c0_41, %c0_42, %c0_43], %70 {strides = array<i32>} : memref<1x1x4x1xf32, #tpu.memory_space<vmem>>, vector<1x1x4x1xf32>,
      %c0_44 = arith.constant 0 : index
      %c0_45 = arith.constant 0 : index
      %71 = vector.load %arg12[%c0_44, %c0_45] : memref<4x1xf32, #tpu.memory_space<vmem>>, vector<4x1xf32>
      %c0_46 = arith.constant 0 : index
      %c0_47 = arith.constant 0 : index
      %c0_48 = arith.constant 0 : index
      %c0_49 = arith.constant 0 : index
      %72 = vector.load %arg7[%c0_46, %c0_47, %c0_48, %c0_49] : memref<1x1x4x1xf32, #tpu.memory_space<vmem>>, vector<1x1x4x1xf32>
      %73 = vector.shape_cast %72 : vector<1x1x4x1xf32> to vector<4x1xf32>
      %74 = vector.shape_cast %71 : vector<4x1xf32> to vector<1x1x4x1xf32>
      tpu.vector_store %arg7[%c0_46, %c0_47, %c0_48, %c0_49], %74 {strides = array<i32>} : memref<1x1x4x1xf32, #tpu.memory_space<vmem>>, vector<1x1x4x1xf32>,
      %c0_50 = arith.constant 0 : index
      %c0_51 = arith.constant 0 : index
      %75 = vector.load %arg13[%c0_50, %c0_51] : memref<4x1xf32, #tpu.memory_space<vmem>>, vector<4x1xf32>
      %c0_52 = arith.constant 0 : index
      %c0_53 = arith.constant 0 : index
      %c0_54 = arith.constant 0 : index
      %c0_55 = arith.constant 0 : index
      %76 = vector.load %arg8[%c0_52, %c0_53, %c0_54, %c0_55] : memref<1x1x4x1xf32, #tpu.memory_space<vmem>>, vector<1x1x4x1xf32>
      %77 = vector.shape_cast %76 : vector<1x1x4x1xf32> to vector<4x1xf32>
      %78 = vector.shape_cast %75 : vector<4x1xf32> to vector<1x1x4x1xf32>
      tpu.vector_store %arg8[%c0_52, %c0_53, %c0_54, %c0_55], %78 {strides = array<i32>} : memref<1x1x4x1xf32, #tpu.memory_space<vmem>>, vector<1x1x4x1xf32>,
      %c0_56 = arith.constant 0 : index
      %c0_57 = arith.constant 0 : index
      %79 = vector.load %arg14[%c0_56, %c0_57] : memref<1x1xf32, #tpu.memory_space<vmem>>, vector<1x1xf32>
      %c0_58 = arith.constant 0 : index
      %c0_59 = arith.constant 0 : index
      %c0_60 = arith.constant 0 : index
      %c0_61 = arith.constant 0 : index
      %80 = vector.load %arg9[%c0_58, %c0_59, %c0_60, %c0_61] : memref<1x1x1x1xf32, #tpu.memory_space<vmem>>, vector<1x1x1x1xf32>
      %81 = vector.shape_cast %80 : vector<1x1x1x1xf32> to vector<1x1xf32>
      %82 = vector.shape_cast %79 : vector<1x1xf32> to vector<1x1x1x1xf32>
      tpu.vector_store %arg9[%c0_58, %c0_59, %c0_60, %c0_61], %82 {strides = array<i32>} : memref<1x1x1x1xf32, #tpu.memory_space<vmem>>, vector<1x1x1x1xf32>,
      %c0_62 = arith.constant 0 : index
      %c0_63 = arith.constant 0 : index
      %83 = vector.load %arg15[%c0_62, %c0_63] : memref<1x1xf32, #tpu.memory_space<vmem>>, vector<1x1xf32>
      %c0_64 = arith.constant 0 : index
      %c0_65 = arith.constant 0 : index
      %c0_66 = arith.constant 0 : index
      %c0_67 = arith.constant 0 : index
      %84 = vector.load %arg10[%c0_64, %c0_65, %c0_66, %c0_67] : memref<1x1x1x1xf32, #tpu.memory_space<vmem>>, vector<1x1x1x1xf32>
      %85 = vector.shape_cast %84 : vector<1x1x1x1xf32> to vector<1x1xf32>
      %86 = vector.shape_cast %83 : vector<1x1xf32> to vector<1x1x1x1xf32>
      tpu.vector_store %arg10[%c0_64, %c0_65, %c0_66, %c0_67], %86 {strides = array<i32>} : memref<1x1x1x1xf32, #tpu.memory_space<vmem>>, vector<1x1x1x1xf32>,
    } else {
    }
    return
  }
  func.func @transform_0(%arg0: i32, %arg1: i32, %arg2: i32) -> (i32, i32, i32) {
    %c1_i32 = arith.constant 1 : i32
    %0 = arith.muli %arg1, %c1_i32 : i32
    %1 = arith.addi %0, %arg2 : i32
    %c0_i32 = arith.constant 0 : i32
    %c0_i32_0 = arith.constant 0 : i32
    return %arg0, %c0_i32, %1 : i32, i32, i32
  }
  func.func @transform_1(%arg0: i32, %arg1: i32, %arg2: i32) -> (i32, i32, i32) {
    %c1_i32 = arith.constant 1 : i32
    %0 = arith.muli %arg1, %c1_i32 : i32
    %1 = arith.addi %0, %arg2 : i32
    %c0_i32 = arith.constant 0 : i32
    %c0_i32_0 = arith.constant 0 : i32
    return %arg0, %c0_i32, %1 : i32, i32, i32
  }
  func.func @transform_2(%arg0: i32, %arg1: i32, %arg2: i32) -> (i32, i32) {
    %c0_i32 = arith.constant 0 : i32
    %c0_i32_0 = arith.constant 0 : i32
    %c0_i32_1 = arith.constant 0 : i32
    return %c0_i32, %c0_i32_0 : i32, i32
  }
  func.func @transform_3(%arg0: i32, %arg1: i32, %arg2: i32) -> (i32, i32, i32, i32) {
    %c0_i32 = arith.constant 0 : i32
    %c0_i32_0 = arith.constant 0 : i32
    %c0_i32_1 = arith.constant 0 : i32
    return %arg0, %arg1, %c0_i32, %c0_i32_0 : i32, i32, i32, i32
  }
  func.func @transform_4(%arg0: i32, %arg1: i32, %arg2: i32) -> (i32, i32, i32, i32) {
    %c0_i32 = arith.constant 0 : i32
    %c0_i32_0 = arith.constant 0 : i32
    %c0_i32_1 = arith.constant 0 : i32
    return %arg0, %arg1, %c0_i32, %c0_i32_0 : i32, i32, i32, i32
  }
  func.func @transform_5(%arg0: i32, %arg1: i32, %arg2: i32) -> (i32, i32, i32, i32) {
    %c0_i32 = arith.constant 0 : i32
    %c0_i32_0 = arith.constant 0 : i32
    %c0_i32_1 = arith.constant 0 : i32
    return %arg0, %arg1, %c0_i32, %c0_i32_0 : i32, i32, i32, i32
  }
  func.func @transform_6(%arg0: i32, %arg1: i32, %arg2: i32) -> (i32, i32, i32, i32) {
    %c0_i32 = arith.constant 0 : i32
    %c0_i32_0 = arith.constant 0 : i32
    %c0_i32_1 = arith.constant 0 : i32
    return %arg0, %arg1, %c0_i32, %c0_i32_0 : i32, i32, i32, i32
  }
  func.func @transform_7(%arg0: i32, %arg1: i32, %arg2: i32) -> (i32, i32, i32, i32) {
    %c0_i32 = arith.constant 0 : i32
    %c0_i32_0 = arith.constant 0 : i32
    %c0_i32_1 = arith.constant 0 : i32
    return %arg0, %arg1, %c0_i32, %c0_i32_0 : i32, i32, i32, i32
  }
}

</mosaic_0001>

<bundles_post_ra>
// kernel: tpu_custom_call.1
= control target key start
LH: loop header
LB: loop body
LE: loop exit
PB: predicated region body
PF: predicated region fallthrough
CT: control target
= control target key end

     0   :  { %13 = vsyncpa [#allocation8], 0  ;;  %s1302_s0 = inlined_call_operand.hbm [shape: f32[2,4,256], index: 0, kind: input, shape index: {}]   ;;  %s1303_s1 = inlined_call_operand.vmem [shape: s32[2,1,256], index: 1, kind: input, shape index: {}]   ;;  %s1304_s2 = inlined_call_operand.vmem [shape: f32[4,1], index: 2, kind: input, shape index: {}]   ;;  %s1305_s3 = inlined_call_operand.vmem [shape: f32[2,1,4,1], index: 3, kind: output, shape index: {0}]   ;;  %s1306_s4 = inlined_call_operand.vmem [shape: f32[2,1,4,1], index: 4, kind: output, shape index: {1}]   ;;  %s1307_s5 = inlined_call_operand.vmem [shape: f32[2,1,4,1], index: 5, kind: output, shape index: {2}]   ;;  %s1308_s6 = inlined_call_operand.vmem [shape: f32[2,1,1,1], index: 6, kind: output, shape index: {3}]   ;;  %s1309_s7 = inlined_call_operand.vmem [shape: f32[2,1,1,1], index: 7, kind: output, shape index: {4}]  }
   0x1   :  { %15 = vsyncpa [#allocation8 + $0x1], 0  ;;  %s1139_s24 = smov 0   ;;  %s1141_s25 = smov 0  }
   0x2   :  { %s1143_s26 = smov 0   ;;  %s1145_s27 = smov 0  }
   0x3   :  { %s1147_s28 = smov 0   ;;  %s1149_s29 = smov 0  }
   0x4 LB: > { %s928_s30 = sadd.s32 4294967295, %s1095_s29   ;;  %s40_s8 = sadd.s32 1, %s1091_s28  ;;  %s1095_s29 = sphi %s1149_s29, %s21_s29   ;;  %s1091_s28 = sphi %s1147_s28, %s1316_s28   ;;  %s1087_s27 = sphi %s1145_s27, %s1315_s27   ;;  %s1083_s26 = sphi %s1143_s26, %s1314_s26   ;;  %s1079_s25 = sphi %s1141_s25, %s1313_s25   ;;  %s1075_s24 = sphi %s1139_s24, %s1312_s24  }
   0x5   : > { %p42_p0 = scmp.ge.s32.totalorder %s40_s8, 2  ;;  %s51_s9 = sadd.s32 1, %s1083_s26 }
   0x6   : > { %p58_p1 = scmp.ne.s32.totalorder %s1083_s26, %s1079_s25  ;;  %p59_p2 = scmp.eq.s32.totalorder %s1095_s29, 0 }
   0x7   : > { %s1318_s8 = smov (%p42_p0, %s40_s8), 0  ;;  %p64_p4 = scmp.ne.s32.totalorder %s1079_s25, %s1075_s24 }
   0x8   : > { %p1175_p3 = por %p59_p2, %p58_p1  ;;  %s46_s11 = ssub.s32 %s1091_s28, %s1318_s8 }
   0x9   : > { %p65_p5 = scmp.eq.s32.totalorder %s928_s30, 0  ;;  %p49_p6 = scmp.eq.s32.totalorder %s46_s11, 0 }
   0xa   : > { %p953_p8 = scmp.lt.s32.totalorder %s1095_s29, 2  ;;  %s282_s14 = sand.u32 1, %s1083_s26  }
   0xb   : > { %p1182_p7 = por %p65_p5, %p64_p4  ;;  %s946_s15 = sshll.u32 %s1091_s28, 3 }
   0xc   : > { %s1188_s13 = scalar_select %p49_p6, %s1083_s26, %s51_s9  }
   0xd   : > { %s932_s16 = sshll.u32 %s282_s14, 3  ;;  %s294_s19 = scalar_lea.hbm %s1302_s0, %s946_s15 }
   0xe   : > { %s296_s20 = sshll.u32 %s294_s19, 4  ;;  %s286_s21 = scalar_lea.vmem [#allocation7], %s932_s16  ;;  %s297_s20 = int_to_ptr.hbm [resolvable:$true] %s296_s20 }
   0xf   : > { %s298_s22 = sshll.u32 %s286_s21, 4  ;;  %p950_p9 = pnand %p953_p8, %p1175_p3  ;;  %s299_s22 = int_to_ptr.vmem [resolvable:$true] %s298_s22 }
  0x10   : > { %p935_p10 = scmp.ge.s32.totalorder %s1095_s29, 1  ;;  %p317_p11 = scmp.lt.s32.totalorder %s1095_s29, 3 }
  0x11   : > { %s283_s23 = scalar_lea.sflag [#allocation8], %s282_s14 }
  0x12   : > { %952 = dma.hbm_to_vmem [thread:$0]  (!%p950_p9), %s297_s20, 128, %s299_s22, %s283_s23  }
  0x13   : > { %p318_p12 = pnand %p935_p10, %p317_p11 }
  0x14   : > { %s323_s24 = sand.u32 (!%p318_p12), 1, %s1079_s25  }
  0x15   : > { %321 = sbr.rel (%p318_p12) target bundleno = 307 (0x133), region = 32  ;;  %s936_s30 = sshll.u32 (!%p318_p12), %s323_s24, 3 }
  0x16   : > { %s324_s9 = scalar_lea.sflag (!%p318_p12), [#allocation8], %s323_s24  ;;  %s327_s11 = scalar_lea.vmem (!%p318_p12), [#allocation7], %s936_s30 }
  0x1a   : > { %1070 = dma.done.wait (%p1182_p7), %s324_s9, 128  }
  0x1b   : > { %1072 = vsyncadd (%p1182_p7), %s324_s9, 4294967168  ;;  %v1097_v0 = vmov 0   ;;  %v455_v1 = vld [vmem:[%s1304_s2] sm:$0xf]  ;;  %vm475_vm0 = vcmask 1043456   ;;  %p400_p13 = scmp.lt.s32.totalorder %s1087_s27, 1  ;;  %v456_v32 = vlaneseq }
  0x1c   : > { %1004 = vset.pattern.permute.xlu0 %v1097_v0  ;;  %v453_v2 = vld [vmem:[%s327_s11] sm:$0xff]  ;;  %v1098_v45 = vmov 0.0   ;;  %vm611_vm3 = vcmask 1040384   ;;  %vm450_vm4 = vcmask 0   ;;  %vm446_vm6 = vcmask 3072  }
  0x1d   : > { %589 = vperm.xlu0 %1004, %v455_v1   ;;  %470 = vst [vmem:[#allocation1] ss:$2 sm:$0xff] %v453_v2  ;;  %s1320_s27 = smov (!%p400_p13, %s1087_s27), 1  ;;  %v457_v38 = vshrl.u32 %v456_v32, 7 }
  0x1e   : > { %s937_s12 = sshll.u32 %s1320_s27, 1  ;;  %451 = vst.msk [vmem:[#allocation5] sm:$0x1] %vm450_vm4, %v1098_v45  ;;  %s938_s18 = sshll.u32 %s1320_s27, 2 }
  0x1f   : > { %s406_s17 = scalar_lea.vmem %s1303_s1, %s937_s12  ;;  %452 = vst.msk [vmem:[#allocation6] sm:$0x1] %vm450_vm4, %v1098_v45  ;;  %s422_s21 = scalar_lea.vmem %s1306_s4, %s938_s18 }
  0x20   : > { %v1220_v35 = vld [vmem:[%s406_s17] sm:$0x3]  ;;  %448 = vst.msk [vmem:[#allocation3] sm:$0xf] %vm446_vm6, %v1098_v45  ;;  %s429_s24 = scalar_lea.vmem %s1307_s5, %s938_s18  ;;  %s415_s11 = scalar_lea.vmem %s1305_s3, %s938_s18 }
  0x21   : > { %v459_v39 = vperm.slane %v1220_v35, 1  ;;  %v458_v44 = vperm.slane %v1220_v35, 0  ;;  %vm462_vm5 = vcmp.ne.s32.totalorder %v1220_v35, 4294967196  ;;  %447 = vst.msk [vmem:[#allocation2] sm:$0xf] %vm446_vm6, %v1098_v45  ;;  %s435_s12 = scalar_lea.vmem %s1308_s6, %s1320_s27  ;;  %s441_s17 = scalar_lea.vmem %s1309_s7, %s1320_s27 }
  0x22   : > { %449 = vst.msk [vmem:[#allocation4] sm:$0xf] %vm446_vm6, %v1098_v45 }
  0x23   : > { %vm461_vm1 = vcmp.eq.s32.totalorder %v459_v39, %v457_v38  ;;  %vm460_vm2 = vcmp.eq.s32.totalorder %v458_v44, %v457_v38 }
  0x24   : > { %v471_v3 = vld.sshfl [vmem:[#allocation1] sm:$0xff pattern:$0x75316420]  ;;  %v472_v4 = vld.sshfl [vmem:[#allocation1 + $0x8] sm:$0xff pattern:$0x75316420] }
  0x25   : > { %v476_v5 = vsel %vm475_vm0, %v471_v3, -inf  ;;  %v483_v6 = vsel %vm475_vm0, %v472_v4, -inf  ;;  %v942_v46 = vsel %vm461_vm1, 1.0, %v1098_v45  ;;  %v941_v50 = vsel %vm460_vm2, 1.0, %v1098_v45 }
  0x26   : > { %v477_v7 = vrot.slane %v476_v5, 4  ;;  %v484_v8 = vrot.slane %v483_v6, 4  ;;  %v532_v48 = vrot.slane %v942_v46, 4 }
  0x28   : > { %v478_v9 = vmax.f32 %v476_v5, %v477_v7  ;;  %v485_v10 = vmax.f32 %v483_v6, %v484_v8  ;;  %v533_v53 = vsel %vm475_vm0, %v941_v50, %v532_v48 }
  0x2a   : > { %v479_v11 = vrot.slane %v478_v9, 2  ;;  %v486_v12 = vrot.slane %v485_v10, 2 }
  0x2c   : > { %v480_v13 = vmax.f32 %v478_v9, %v479_v11  ;;  %v487_v14 = vmax.f32 %v485_v10, %v486_v12 }
  0x2e   : > { %v481_v15 = vrot.slane %v480_v13, 1  ;;  %v488_v16 = vrot.slane %v487_v14, 1 }
  0x30   : > { %v482_v17 = vmax.f32 %v480_v13, %v481_v15  ;;  %v489_v18 = vmax.f32 %v487_v14, %v488_v16 }
  0x32   : > { %v492_v19 = vrot.slane %v489_v18, 4 }
  0x34   : > { %v493_v20 = vsel %vm475_vm0, %v482_v17, %v492_v19 }
  0x35   : > { %v495_v21 = vsub.f32 %v453_v2, %v493_v20 }
  0x37   : > { %v496_v22 = vmul.f32 1.442695, %v495_v21 }
  0x39   : > { %1005 = vpow2.f32 %v496_v22 }
  0x3f   : > { %v1006_v23 = vpop.eup %1005 }
  0x40   : > { %499 = vst [vmem:[#allocation1] ss:$2 sm:$0xff] %v1006_v23 }
  0x47   : > { %v500_v24 = vld.sshfl [vmem:[#allocation1] sm:$0xff pattern:$0x75316420]  ;;  %v501_v25 = vld.sshfl [vmem:[#allocation1 + $0x8] sm:$0xff pattern:$0x75316420] }
  0x48   : > { %v504_v26 = vsel %vm475_vm0, %v500_v24, 0.0  ;;  %v511_v27 = vsel %vm475_vm0, %v501_v25, 0.0 }
  0x49   : > { %v505_v28 = vrot.slane %v504_v26, 4  ;;  %v512_v29 = vrot.slane %v511_v27, 4 }
  0x4b   : > { %v506_v30 = vadd.f32 %v505_v28, %v504_v26  ;;  %v513_v31 = vadd.f32 %v512_v29, %v511_v27  ;;  %v558_v28 = vsel %vm475_vm0, %v941_v50, 0.0  ;;  %v559_v29 = vsel %vm475_vm0, %v942_v46, 0.0 }
  0x4d   : > { %v507_v33 = vrot.slane %v506_v30, 2  ;;  %v514_v34 = vrot.slane %v513_v31, 2 }
  0x4f   : > { %v508_v36 = vadd.f32 %v507_v33, %v506_v30  ;;  %v515_v37 = vadd.f32 %v514_v34, %v513_v31  ;;  %v560_v30 = vadd.f32 %v559_v29, %v558_v28 }
  0x51   : > { %v509_v40 = vrot.slane %v508_v36, 1  ;;  %v516_v41 = vrot.slane %v515_v37, 1 }
  0x53   : > { %v510_v42 = vadd.f32 %v509_v40, %v508_v36  ;;  %v517_v43 = vadd.f32 %v516_v41, %v515_v37 }
  0x55   : > { %1007 = vrcp.f32 %v510_v42 }
  0x56   : > { %1009 = vrcp.f32 %v517_v43 }
  0x57   : > { %1011 = vlog2.f32 %v517_v43 }
  0x58   : > { %1013 = vlog2.f32 %v510_v42 }
  0x5b   : > { %v1008_v47 = vpop.eup %1007 }
  0x5c   : > { %v1010_v49 = vpop.eup %1009 }
  0x5d   : > { %v522_v51 = vrot.slane %v1010_v49, 4  ;;  %v1012_v6 = vpop.eup %1011 }
  0x5e   : > { %v1014_v9 = vpop.eup %1013  ;;  %v529_v13 = vmul.f32 0.6931472, %v1012_v6  ;;  %v641_v6 = vld [vmem:[#allocation2] sm:$0xf] }
  0x5f   : > { %v523_v52 = vsel %vm475_vm0, %v1008_v47, %v522_v51  ;;  %v527_v12 = vmul.f32 0.6931472, %v1014_v9  ;;  %v943_v51 = vsel %vm462_vm5, 1.0, %v1098_v45 }
  0x60   : > { %v525_v54 = vmul.f32 %v1006_v23, %v523_v52 }
  0x62   : > { %v535_v55 = vmul.f32 %v533_v53, %v525_v54 }
  0x64   : > { %537 = vst [vmem:[#allocation1] ss:$2 sm:$0xff] %v535_v55 }
  0x6b   : > { %v538_v56 = vld.sshfl [vmem:[#allocation1] sm:$0xff pattern:$0x75316420]  ;;  %v539_v57 = vld.sshfl [vmem:[#allocation1 + $0x8] sm:$0xff pattern:$0x75316420] }
  0x6c   : > { %548 = vst [vmem:[#allocation1] ss:$2 sm:$0xff] %v525_v54  ;;  %v542_v31 = vsel %vm475_vm0, %v538_v56, 0.0  ;;  %v543_v32 = vsel %vm475_vm0, %v539_v57, 0.0 }
  0x6d   : > { %v544_v36 = vadd.f32 %v543_v32, %v542_v31 }
  0x6f   : > { %545 = vadd.xlane.f32.xlu0 %v544_v36 }
  0x73   : > { %v549_v58 = vld.sshfl [vmem:[#allocation1] sm:$0xff pattern:$0x75316420]  ;;  %v550_v59 = vld.sshfl [vmem:[#allocation1 + $0x8] sm:$0xff pattern:$0x75316420] }
  0x74   : > { %564 = vst [vmem:[#allocation1] ss:$2 sm:$0xff] %v495_v21  ;;  %v553_v16 = vsel %vm475_vm0, %v549_v58, 0.0  ;;  %v554_v17 = vsel %vm475_vm0, %v550_v59, 0.0 }
  0x75   : > { %v555_v20 = vadd.f32 %v554_v17, %v553_v16 }
  0x77   : > { %556 = vadd.xlane.f32.xlu1 %v555_v20 }
  0x7b   : > { %v565_v60 = vld.sshfl [vmem:[#allocation1] sm:$0xff pattern:$0x75316420]  ;;  %v566_v61 = vld.sshfl [vmem:[#allocation1 + $0x8] sm:$0xff pattern:$0x75316420] }
  0x7c   : > { %v569_v62 = vmul.f32 %v941_v50, %v565_v60  ;;  %v570_v63 = vmul.f32 %v942_v46, %v566_v61 }
  0x7e   : > { %v571_v0 = vsel %vm475_vm0, %v569_v62, 0.0  ;;  %v578_v1 = vsel %vm475_vm0, %v570_v63, 0.0 }
  0x7f   : > { %v572_v2 = vrot.slane %v571_v0, 4  ;;  %v579_v3 = vrot.slane %v578_v1, 4  ;;  %561 = vadd.xlane.f32.xlu1 %v560_v30 }
  0x81   : > { %v573_v4 = vadd.f32 %v572_v2, %v571_v0  ;;  %v580_v5 = vadd.f32 %v579_v3, %v578_v1  ;;  %v645_v1 = vld [vmem:[#allocation3] sm:$0xf] }
  0x83   : > { %v574_v7 = vrot.slane %v573_v4, 2  ;;  %v581_v8 = vrot.slane %v580_v5, 2 }
  0x85   : > { %v582_v10 = vadd.f32 %v581_v8, %v580_v5  ;;  %v575_v11 = vadd.f32 %v574_v7, %v573_v4  ;;  %v648_v4 = vld [vmem:[#allocation4] sm:$0xf] }
  0x87   : > { %v576_v14 = vrot.slane %v575_v11, 1  ;;  %v583_v15 = vrot.slane %v582_v10, 1 }
  0x89   : > { %v577_v18 = vadd.f32 %v576_v14, %v575_v11  ;;  %v584_v19 = vadd.f32 %v583_v15, %v582_v10  ;;  %v651_v11 = vld [vmem:[#allocation5] sm:$0x1]  ;;  %v655_v14 = vld [vmem:[#allocation6] sm:$0x1] }
  0x8b   : > { %v585_v21 = vsub.f32 %v527_v12, %v577_v18  ;;  %v586_v22 = vsub.f32 %v529_v13, %v584_v19 }
  0x8d   : > { %v617_v23 = vrot.slane %v586_v22, 7 }
  0x8f   : > { %v590_v24 = vpop.permute.xlu0 %589  ;;  %v618_v25 = vsel %vm611_vm3, %v585_v21, %v617_v23 }
  0x90   : > { %v592_v26 = vmul.f32 %v941_v50, %v590_v24  ;;  %v593_v27 = vmul.f32 %v942_v46, %v590_v24 }
  0x92   : > { %v594_v33 = vsel %vm475_vm0, %v592_v26, 0.0  ;;  %v601_v34 = vsel %vm475_vm0, %v593_v27, 0.0 }
  0x93   : > { %v595_v37 = vrot.slane %v594_v33, 4  ;;  %v602_v38 = vrot.slane %v601_v34, 4 }
  0x95   : > { %v596_v39 = vadd.f32 %v595_v37, %v594_v33  ;;  %v603_v40 = vadd.f32 %v602_v38, %v601_v34 }
  0x97   : > { %v597_v41 = vrot.slane %v596_v39, 2  ;;  %v604_v42 = vrot.slane %v603_v40, 2 }
  0x99   : > { %v598_v43 = vadd.f32 %v597_v41, %v596_v39  ;;  %v605_v44 = vadd.f32 %v604_v42, %v603_v40 }
  0x9b   : > { %v599_v46 = vrot.slane %v598_v43, 1  ;;  %v606_v47 = vrot.slane %v605_v44, 1 }
  0x9d   : > { %v607_v48 = vadd.f32 %v606_v47, %v605_v44  ;;  %v600_v49 = vadd.f32 %v599_v46, %v598_v43 }
  0x9f   : > { %v610_v50 = vrot.slane %v607_v48, 7 }
  0xa1   : > { %v612_v52 = vsel %vm611_vm3, %v600_v49, %v610_v50 }
  0xa2   : > { %v614_v53 = vmul.f32 %v943_v51, %v612_v52 }
  0xa4   : > { %v620_v54 = vmul.f32 %v618_v25, %v614_v53  ;;  %v632_v60 = vperm.slane %v614_v53, 0  ;;  %v633_v61 = vperm.slane %v614_v53, 1 }
  0xa6   : > { %v622_v55 = vperm.slane %v620_v54, 0  ;;  %v623_v56 = vperm.slane %v620_v54, 1  ;;  %v636_v35 = vsel %vm611_vm3, %v632_v60, 0.0  ;;  %v637_v62 = vsel %vm611_vm3, %v633_v61, 0.0 }
  0xa7   : > { %v638_v63 = vadd.f32 %v637_v62, %v636_v35 }
  0xa8   : > { %v626_v57 = vsel %vm611_vm3, %v622_v55, 0.0  ;;  %v627_v58 = vsel %vm611_vm3, %v623_v56, 0.0 }
  0xa9   : > { %v628_v59 = vadd.f32 %v627_v58, %v626_v57 }
  0xab   : > { %629 = vadd.xlane.f32.xlu2 %v628_v59 }
  0xb3   : > { %639 = vadd.xlane.f32.xlu2 %v638_v63 }
  0xe2   : > { %v546_v5 = vpop.xlane.xlu0 %545 }
  0xe3   : > { %v642_v9 = vadd.f32 %v641_v6, %v546_v5 }
  0xe5   : > { %644 = vst.msk [vmem:[#allocation2] sm:$0xf] %vm446_vm6, %v642_v9 }
  0xea   : > { %v557_v0 = vpop.xlane.xlu1 %556 }
  0xeb   : > { %v646_v2 = vadd.f32 %v645_v1, %v557_v0 }
  0xec   : > { %v661_v10 = vld [vmem:[#allocation2] sm:$0xf] }
  0xed   : > { %647 = vst.msk [vmem:[#allocation3] sm:$0xf] %vm446_vm6, %v646_v2 }
  0xee   : > { %662 = vst.msk [vmem:[%s415_s11] sm:$0xf] %vm446_vm6, %v661_v10 }
  0xf2   : > { %v562_v3 = vpop.xlane.xlu1 %561 }
  0xf3   : > { %v649_v8 = vadd.f32 %v648_v4, %v562_v3 }
  0xf4   : > { %v663_v7 = vld [vmem:[#allocation3] sm:$0xf] }
  0xf5   : > { %664 = vst.msk [vmem:[%s422_s21] sm:$0xf] %vm446_vm6, %v663_v7 }
  0xf6   : > { %650 = vst.msk [vmem:[#allocation4] sm:$0xf] %vm446_vm6, %v649_v8 }
  0xfd   : > { %v665_v45 = vld [vmem:[#allocation4] sm:$0xf] }
  0xfe   : > { %666 = vst.msk [vmem:[%s429_s24] sm:$0xf] %vm446_vm6, %v665_v45 }
 0x11e   : > { %v630_v12 = vpop.xlane.xlu2 %629 }
 0x11f   : > { %v652_v13 = vadd.f32 %v651_v11, %v630_v12 }
 0x121   : > { %654 = vst.msk [vmem:[#allocation5] sm:$0x1] %vm450_vm4, %v652_v13 }
 0x126   : > { %v640_v15 = vpop.xlane.xlu2 %639 }
 0x127   : > { %v656_v16 = vadd.f32 %v655_v14, %v640_v15 }
 0x128   : > { %v667_v17 = vld [vmem:[#allocation5] sm:$0x1] }
 0x129   : > { %668 = vst.msk [vmem:[%s435_s12] sm:$0x1] %vm450_vm4, %v667_v17 }
 0x12a   : > { %657 = vst.msk [vmem:[#allocation6] sm:$0x1] %vm450_vm4, %v656_v16 }
 0x131   : > { %v669_v18 = vld [vmem:[#allocation6] sm:$0x1] }
 0x132   : > { %670 = vst.msk [vmem:[%s441_s17] sm:$0x1] %vm450_vm4, %v669_v18 }
 0x133 PF: > { %s21_s29 = sadd.s32 1, %s1095_s29   ;;  %s1312_s24 = smov %s1079_s25 }
 0x134   : > { %p18_p0 = scmp.ge.s32.totalorder %s21_s29, 4   ;;  %s1313_s25 = smov %s1083_s26 }
 0x135   : > { %s1314_s26 = smov %s1188_s13  ;;  %s1315_s27 = smov %s1091_s28 }
 0x136   : > { %s1316_s28 = smov %s1318_s8  ;;  %20 = sbr.rel (!%p18_p0) target bundleno = 4 (0x4), region = 131 }
 0x13b   :  { %772 = vsyncpa [#allocation8], 1 }
 0x13c   :  { %774 = vsyncpa [#allocation8 + $0x1], 1 }

</bundles_post_ra>
